<compile_context>
chip_gen: v5e
topology: v5e:2x2
jax: 0.10.0
libtpu: 0.0.40
codegen_flags: <defaults>
</compile_context>

<pallas_src>
import functools

import jax
import jax.numpy as jnp
from jax.experimental import pallas as pl
from jax.experimental.pallas import tpu as pltpu


def _round_up(a, m):
    return ((a + m - 1) // m) * m


def _cdiv(a, b):
    return -(-a // b)


# ---------------------------------------------------------------------------
# Kernel: one batch tile of   z = x @ W_cat + b_cat   followed by head math.
#
# Slab column layout (all boundaries 128-aligned -> lane-dense stores):
#   [0, G)          pi logits     -> masked softmax
#   [G, G+G*O)      sigma logits  -> exp
#   [G+G*O, E)      zero padding  (exp(0)=1, discarded by the wrapper)
#   [E, E+G*O)      mu logits     -> copied through unchanged (no exp)
#   [E+G*O, N_pad)  zero padding
# with E = round_up(G + G*O, 128) and N_pad = E + round_up(G*O, 128).
# ---------------------------------------------------------------------------
def mdn_kernel(x_ref, w_ref, b_ref, out_ref, *, num_gaussians, head_cols,
               matmul_precision):
    x = x_ref[...]
    # Single fused MXU matmul, f32 accumulation; bias added in f32.
    z = jnp.dot(x, w_ref[...], preferred_element_type=jnp.float32,
                precision=matmul_precision) + b_ref[...]

    # 128-aligned static split: exp/softmax head vs. raw mu tail.
    zh = z[:, :head_cols]
    zm = z[:, head_cols:]

    col = jax.lax.broadcasted_iota(jnp.int32, zh.shape, 1)
    is_pi = col < num_gaussians

    # Masked online softmax over the pi columns; sigma (+pad) columns share the
    # same single EUP exp pass (mu columns are excluded entirely).
    m = jnp.max(jnp.where(is_pi, zh, -jnp.inf), axis=-1, keepdims=True)
    e = jnp.exp(jnp.where(is_pi, zh - m, zh))
    denom = jnp.sum(jnp.where(is_pi, e, 0.0), axis=-1, keepdims=True)
    # EUP approximate reciprocal + one Newton-Raphson step -> ~exact softmax
    # normalization (pi rows sum to 1 within f32 roundoff).
    r = pl.reciprocal(denom, approx=True)
    r = r * (2.0 - denom * r)
    head = jnp.where(is_pi, e * r, e)

    # Two lane-dense (128-aligned offset, 128-multiple width) stores.
    out_ref[:, :head_cols] = head.astype(out_ref.dtype)
    out_ref[:, head_cols:] = zm.astype(out_ref.dtype)


# ---------------------------------------------------------------------------
# One-time parameter prep (do NOT call per forward): fuse the three heads into
# a lane-dense, zero-padded slab and cast weights to the compute dtype.
# ---------------------------------------------------------------------------
def fuse_params(params, num_gaussians, out_features,
                compute_dtype=jnp.bfloat16):
    G, O = num_gaussians, out_features
    GO = G * O
    E = _round_up(G + GO, 128)
    N_pad = E + _round_up(GO, 128)

    w_head = jnp.concatenate([params["wpi"], params["wsig"]], axis=1)
    w_head = jnp.pad(w_head, ((0, 0), (0, E - (G + GO))))
    w_mu = jnp.pad(params["wmu"], ((0, 0), (0, N_pad - E - GO)))
    w_cat = jnp.concatenate([w_head, w_mu], axis=1).astype(compute_dtype)

    b_head = jnp.concatenate([params["bpi"], params["bsig"]], axis=1)
    b_head = jnp.pad(b_head, ((0, 0), (0, E - (G + GO))))
    b_mu = jnp.pad(params["bmu"], ((0, 0), (0, N_pad - E - GO)))
    b_cat = jnp.concatenate([b_head, b_mu], axis=1).astype(jnp.float32)

    return {"w_cat": w_cat, "b_cat": b_cat, "head_cols": E, "n_pad": N_pad}


# ---------------------------------------------------------------------------
# Forward pass.
# ---------------------------------------------------------------------------
def mdn_forward(x, fused, num_gaussians, out_features, *,
                batch_tile=1024, out_dtype=jnp.float32):
    """x: (B, D).  fused: result of fuse_params (pre-fused/padded/cast weights).
    Returns (pi (B,G), sigma (B,G,O), mu (B,G,O)) in float32."""
    B, D = x.shape
    G, O = num_gaussians, out_features
    GO = G * O
    w_cat, b_cat = fused["w_cat"], fused["b_cat"]
    E, N_pad = fused["head_cols"], fused["n_pad"]
    compute_dtype = w_cat.dtype

    x_in = x.astype(compute_dtype)

    # ---- batch tiling ------------------------------------------------------
    #  * TB multiple of 8 (sublane granularity).
    #  * Aim for >= 4 grid steps when B allows it so v7x's two TensorCores both
    #    get work and the pipeline has something to overlap; cap at batch_tile
    #    (1-2k rows amortizes the ~0.35us/step overhead on v5e/v6e).
    #  * TB ~ cdiv(B, 4) -> tail padding is at most TB-1 (< ~B/4) rows.
    TB = max(8, min(batch_tile, _round_up(_cdiv(B, 4), 8)))
    num_tiles = _cdiv(B, TB)
    B_pad = num_tiles * TB
    if B_pad != B:
        x_in = jnp.pad(x_in, ((0, B_pad - B), (0, 0)))

    # ---- VMEM budget: double-buffered x/out tiles + single-buffered weights.
    x_bytes = jnp.dtype(compute_dtype).itemsize
    o_bytes = jnp.dtype(out_dtype).itemsize
    vmem_need = (2 * TB * D * x_bytes          # x tiles (double-buffered)
                 + 2 * TB * N_pad * o_bytes    # out tiles (double-buffered)
                 + D * N_pad * x_bytes         # W_cat (Buffered(1), resident)
                 + N_pad * 4)                  # b_cat
    vmem_limit = int(min(max(2 * vmem_need, 32 << 20), 64 << 20))

    cost = pl.CostEstimate(
        flops=2 * B_pad * D * N_pad,
        transcendentals=B_pad * (E + 1),       # exp on head cols + reciprocal
        bytes_accessed=(B_pad * D * x_bytes + D * N_pad * x_bytes
                        + N_pad * 4 + B_pad * N_pad * o_bytes),
    )

    matmul_precision = (jax.lax.Precision.HIGHEST
                        if compute_dtype == jnp.float32
                        else jax.lax.Precision.DEFAULT)
    kernel = functools.partial(mdn_kernel, num_gaussians=G, head_cols=E,
                               matmul_precision=matmul_precision)

    slab = pl.pallas_call(
        kernel,
        out_shape=jax.ShapeDtypeStruct((B_pad, N_pad), out_dtype),
        grid=(num_tiles,),
        in_specs=[
            # x: tiled over batch, double-buffered by the auto-pipeline.
            pl.BlockSpec((TB, D), lambda i: (i, 0)),
            # Weights / bias: constant index_map -> fetched once; Buffered(1)
            # avoids double-buffering the resident copy (v7x 64 MiB VMEM).
            pl.BlockSpec((D, N_pad), lambda i: (0, 0),
                         pipeline_mode=pl.Buffered(1)),
            pl.BlockSpec((1, N_pad), lambda i: (0, 0),
                         pipeline_mode=pl.Buffered(1)),
        ],
        out_specs=pl.BlockSpec((TB, N_pad), lambda i: (i, 0)),
        compiler_params=pltpu.CompilerParams(
            dimension_semantics=("parallel",),   # v7x: shard batch over 2 TCs
            vmem_limit_bytes=vmem_limit,
        ),
        cost_estimate=cost,
    )(x_in, w_cat, b_cat)

    # Wrapper glue: slice padding off, reshape to (B, G, O).
    # TODO(synk): for a fully fused pipeline, consume the slab (MDN NLL /
    # sampling) inside the kernel instead of re-reading it here.
    slab = slab.astype(jnp.float32)
    pi = slab[:B, :G]
    sigma = slab[:B, G:G + GO].reshape(B, G, O)
    mu = slab[:B, E:E + GO].reshape(B, G, O)
    return pi, sigma, mu


def init_params(key, in_features, out_features, num_gaussians):
    """Deterministic init mimicking nn.Linear default (uniform +-1/sqrt(fan_in)).
    Weights stored pre-transposed: (in_features, out_dim)."""
    D, O, G = in_features, out_features, num_gaussians
    bound = 1.0 / (D ** 0.5)
    ks = jax.random.split(key, 6)

    def u(k, shape):
        return jax.random.uniform(k, shape, jnp.float32, -bound, bound)

    return {
        "wpi": u(ks[0], (D, G)),
        "bpi": u(ks[1], (1, G)),
        "wsig": u(ks[2], (D, G * O)),
        "bsig": u(ks[3], (1, G * O)),
        "wmu": u(ks[4], (D, G * O)),
        "bmu": u(ks[5], (1, G * O)),
    }


if __name__ == "__main__":
    in_features = 32
    out_features = 4
    num_gaussians = 8

    key = jax.random.PRNGKey(0)
    kx1, kx2, kp = jax.random.split(key, 3)
    params = init_params(kp, in_features, out_features, num_gaussians)

    def reference(x):
        hp = jax.lax.Precision.HIGHEST
        B = x.shape[0]
        logits = jnp.dot(x, params["wpi"], precision=hp) + params["bpi"]
        pi = jax.nn.softmax(logits, axis=1)
        sigma = jnp.exp(jnp.dot(x, params["wsig"], precision=hp) + params["bsig"])
        mu = jnp.dot(x, params["wmu"], precision=hp) + params["bmu"]
        return (pi,
                sigma.reshape(B, num_gaussians, out_features),
                mu.reshape(B, num_gaussians, out_features))

    # ---- test 1: f32 compute path, single-tile batch, tight tolerances -----
    batch = 8
    x = jax.random.normal(kx1, (batch, in_features), jnp.float32)
    fused_f32 = fuse_params(params, num_gaussians, out_features,
                            compute_dtype=jnp.float32)
    pi, sigma, mu = mdn_forward(x, fused_f32, num_gaussians, out_features)
    jax.block_until_ready((pi, sigma, mu))

    pi_r, sigma_r, mu_r = reference(x)
    assert pi.shape == (batch, num_gaussians)
    assert sigma.shape == (batch, num_gaussians, out_features)
    assert mu.shape == (batch, num_gaussians, out_features)
    assert jnp.allclose(pi, pi_r, atol=1e-3, rtol=1e-3)
    assert jnp.allclose(jnp.sum(pi, axis=-1), jnp.ones((batch,)), atol=1e-3)
    assert jnp.allclose(sigma, sigma_r, atol=1e-3, rtol=1e-3)
    assert jnp.allclose(mu, mu_r, atol=1e-3, rtol=1e-3)

    # ---- test 2: default bf16 compute path, multi-tile grid + tail padding -
    batch2 = 20
    x2 = jax.random.normal(kx2, (batch2, in_features), jnp.float32)
    fused_bf16 = fuse_params(params, num_gaussians, out_features)  # bf16 default
    pi2, sigma2, mu2 = mdn_forward(x2, fused_bf16, num_gaussians, out_features)
    jax.block_until_ready((pi2, sigma2, mu2))

    pi2_r, sigma2_r, mu2_r = reference(x2)
    assert pi2.shape == (batch2, num_gaussians)
    assert sigma2.shape == (batch2, num_gaussians, out_features)
    assert mu2.shape == (batch2, num_gaussians, out_features)
    assert jnp.allclose(pi2, pi2_r, atol=6e-2, rtol=6e-2)
    assert jnp.allclose(jnp.sum(pi2, axis=-1), jnp.ones((batch2,)), atol=1e-2)
    assert jnp.allclose(sigma2, sigma2_r, atol=6e-2, rtol=6e-2)
    assert jnp.allclose(mu2, mu2_r, atol=6e-2, rtol=6e-2)

    print("KERNEL_OK")
</pallas_src>

<mosaic_0001>
module attributes {stable_mosaic.version = 11 : i64} {
  func.func @mdn_kernel(%arg0: i32, %arg1: memref<8x32xf32, #tpu.memory_space<vmem>>, %arg2: memref<32x256xf32, #tpu.memory_space<vmem>>, %arg3: memref<1x256xf32, #tpu.memory_space<vmem>>, %arg4: memref<8x256xf32, #tpu.memory_space<vmem>>) attributes {dimension_semantics = [#tpu.dimension_semantics<parallel>], iteration_bounds = array<i64: 1>, scalar_prefetch = 0 : i64, scratch_operands = 0 : i64, tpu.core_type = #tpu.core_type<tc>, window_params = [{transform_indices = @transform_0, window_bounds = array<i64: 8, 32>}, {pipeline_mode = #tpu.pipeline_mode<synchronous>, transform_indices = @transform_1, window_bounds = array<i64: 32, 256>}, {pipeline_mode = #tpu.pipeline_mode<synchronous>, transform_indices = @transform_2, window_bounds = array<i64: 1, 256>}, {transform_indices = @transform_3, window_bounds = array<i64: 8, 256>}]} {
    %c0 = arith.constant 0 : index
    %c0_0 = arith.constant 0 : index
    %0 = vector.load %arg1[%c0, %c0_0] : memref<8x32xf32, #tpu.memory_space<vmem>>, vector<8x32xf32>
    %c0_1 = arith.constant 0 : index
    %c0_2 = arith.constant 0 : index
    %1 = vector.load %arg2[%c0_1, %c0_2] : memref<32x256xf32, #tpu.memory_space<vmem>>, vector<32x256xf32>
    %cst = arith.constant dense<0.000000e+00> : vector<8x256xf32>
    %2 = tpu.matmul %0, %1, %cst {dimension_numbers = #tpu.dot_dimension_numbers<[1], [0], [0], [1], [0, 0, 1, 1], [], []>, precision = #tpu.contract_precision<fp32>} : vector<8x32xf32>, vector<32x256xf32>, vector<8x256xf32> -> vector<8x256xf32>
    %c0_3 = arith.constant 0 : index
    %c0_4 = arith.constant 0 : index
    %3 = vector.load %arg3[%c0_3, %c0_4] : memref<1x256xf32, #tpu.memory_space<vmem>>, vector<1x256xf32>
    %4 = vector.broadcast %3 : vector<1x256xf32> to vector<8x256xf32>
    %5 = arith.addf %2, %4 : vector<8x256xf32>
    %6 = vector.extract_strided_slice %5 {offsets = [0, 0], sizes = [8, 128], strides = [1, 1]} : vector<8x256xf32> to vector<8x128xf32>
    %7 = vector.extract_strided_slice %5 {offsets = [0, 128], sizes = [8, 128], strides = [1, 1]} : vector<8x256xf32> to vector<8x128xf32>
    %8 = tpu.iota {dimensions = array<i32: 1>} : vector<8x128xi32>
    %c8_i32 = arith.constant 8 : i32
    %9 = vector.broadcast %c8_i32 : i32 to vector<8x128xi32>
    %10 = arith.cmpi slt, %8, %9 : vector<8x128xi32>
    %cst_5 = arith.constant 0xFF800000 : f32
    %11 = vector.broadcast %cst_5 : f32 to vector<8x128xf32>
    %12 = arith.select %10, %6, %11 : vector<8x128xi1>, vector<8x128xf32>
    %cst_6 = arith.constant dense<0xFF800000> : vector<8xf32>
    %13 = vector.multi_reduction <maximumf>, %12, %cst_6 [1] : vector<8x128xf32> to vector<8xf32>
    %14 = vector.shape_cast %13 : vector<8xf32> to vector<8x1xf32>
    %15 = vector.broadcast %14 : vector<8x1xf32> to vector<8x128xf32>
    %16 = arith.subf %6, %15 : vector<8x128xf32>
    %17 = arith.select %10, %16, %6 : vector<8x128xi1>, vector<8x128xf32>
    %18 = math.exp %17 : vector<8x128xf32>
    %cst_7 = arith.constant 0.000000e+00 : f32
    %19 = vector.broadcast %cst_7 : f32 to vector<8x128xf32>
    %20 = arith.select %10, %18, %19 : vector<8x128xi1>, vector<8x128xf32>
    %cst_8 = arith.constant dense<0.000000e+00> : vector<8xf32>
    %21 = vector.multi_reduction <add>, %20, %cst_8 [1] : vector<8x128xf32> to vector<8xf32>
    %22 = vector.shape_cast %21 : vector<8xf32> to vector<8x1xf32>
    %23 = tpu.reciprocal %22 {approx = true} : vector<8x1xf32> -> vector<8x1xf32>
    %24 = arith.mulf %22, %23 : vector<8x1xf32>
    %cst_9 = arith.constant 2.000000e+00 : f32
    %25 = vector.broadcast %cst_9 : f32 to vector<8x1xf32>
    %26 = arith.subf %25, %24 : vector<8x1xf32>
    %27 = arith.mulf %23, %26 : vector<8x1xf32>
    %28 = vector.broadcast %27 : vector<8x1xf32> to vector<8x128xf32>
    %29 = arith.mulf %18, %28 : vector<8x128xf32>
    %30 = arith.select %10, %29, %18 : vector<8x128xi1>, vector<8x128xf32>
    %c0_10 = arith.constant 0 : index
    %c0_11 = arith.constant 0 : index
    %31 = vector.load %arg4[%c0_10, %c0_11] : memref<8x256xf32, #tpu.memory_space<vmem>>, vector<8x128xf32>
    tpu.vector_store %arg4[%c0_10, %c0_11], %30 {strides = array<i32>} : memref<8x256xf32, #tpu.memory_space<vmem>>, vector<8x128xf32>,
    %c0_12 = arith.constant 0 : index
    %c128 = arith.constant 128 : index
    %32 = vector.load %arg4[%c0_12, %c128] : memref<8x256xf32, #tpu.memory_space<vmem>>, vector<8x128xf32>
    tpu.vector_store %arg4[%c0_12, %c128], %7 {strides = array<i32>} : memref<8x256xf32, #tpu.memory_space<vmem>>, vector<8x128xf32>,
    return
  }
  func.func @transform_0(%arg0: i32) -> (i32, i32) {
    %c0_i32 = arith.constant 0 : i32
    %c0_i32_0 = arith.constant 0 : i32
    return %arg0, %c0_i32 : i32, i32
  }
  func.func @transform_1(%arg0: i32) -> (i32, i32) {
    %c0_i32 = arith.constant 0 : i32
    %c0_i32_0 = arith.constant 0 : i32
    %c0_i32_1 = arith.constant 0 : i32
    return %c0_i32, %c0_i32_0 : i32, i32
  }
  func.func @transform_2(%arg0: i32) -> (i32, i32) {
    %c0_i32 = arith.constant 0 : i32
    %c0_i32_0 = arith.constant 0 : i32
    %c0_i32_1 = arith.constant 0 : i32
    return %c0_i32, %c0_i32_0 : i32, i32
  }
  func.func @transform_3(%arg0: i32) -> (i32, i32) {
    %c0_i32 = arith.constant 0 : i32
    %c0_i32_0 = arith.constant 0 : i32
    return %arg0, %c0_i32 : i32, i32
  }
}

</mosaic_0001>

<bundles_post_ra>
// kernel: tpu_custom_call.1
= control target key start
LH: loop header
LB: loop body
LE: loop exit
PB: predicated region body
PF: predicated region fallthrough
CT: control target
= control target key end

     0   :  { %8 = vsyncpa [#allocation3], 0  ;;  %s678_s0 = inlined_call_operand.hbm [shape: f32[8,32], index: 0, kind: input, shape index: {}]   ;;  %s679_s1 = inlined_call_operand.hbm [shape: f32[32,256], index: 1, kind: input, shape index: {}]   ;;  %s680_s2 = inlined_call_operand.hbm [shape: f32[1,256], index: 2, kind: input, shape index: {}]   ;;  %s681_s3 = inlined_call_operand.hbm [shape: f32[8,256], index: 3, kind: output, shape index: {}]  }
   0x1   :  { %9 = vsyncpa [#allocation6], 0  ;;  %s26_s14 = sshll.u32 %s679_s1, 4  ;;  %s27_s14 = int_to_ptr.hbm [resolvable:$true] %s26_s14 }
   0x2   :  { %10 = vsyncpa [#allocation4], 0  ;;  %s598_s15 = smov [#allocation5]   ;;  %s16_s19 = sshll.u32 %s678_s0, 4  ;;  %s17_s19 = int_to_ptr.hbm [resolvable:$true] %s16_s19 }
   0x3   :  { %s28_s16 = sshll.u32 %s598_s15, 4  ;;  %s599_s20 = smov 256   ;;  %s29_s16 = int_to_ptr.vmem [resolvable:$true] %s28_s16 }
   0x4   :  { %s600_s21 = smov 16   ;;  %s601_s22 = smov [#allocation2]  }
   0x5   :  { %34 = dma.hbm_to_vmem [thread:$0]  %s27_s14, 1024, %s29_s16, [#allocation6], %s599_s20, %s599_s20, %s600_s21  }
   0x6   :  { %s18_s23 = sshll.u32 %s601_s22, 4  ;;  %s40_s26 = sshll.u32 %s680_s2, 4  ;;  %s19_s23 = int_to_ptr.vmem [resolvable:$true] %s18_s23  ;;  %s41_s26 = int_to_ptr.hbm [resolvable:$true] %s40_s26 }
   0x7   :  { %21 = dma.hbm_to_vmem [thread:$0]  %s17_s19, 128, %s19_s23, [#allocation3]  }
   0x8   :  { %s602_s1 = smov [#allocation7]  }
   0x9   :  { %s42_s27 = sshll.u32 %s602_s1, 4  ;;  %s43_s27 = int_to_ptr.vmem [resolvable:$true] %s42_s27 }
   0xa   :  { %45 = dma.hbm_to_vmem [thread:$0]  %s41_s26, 32, %s43_s27, [#allocation6]  }
   0xb   :  { %592 = dma.done.wait [#allocation3], 128  }
   0xc   :  { %593 = vsyncadd [#allocation3], 4294967168 }
   0xd   :  { %594 = dma.done.wait [#allocation6], 1056  }
   0xe   :  { %595 = vsyncadd [#allocation6], 4294966240  ;;  %vm73_vm0 = vcmask 261120   ;;  %v65_v0 = vld [vmem:[#allocation5 + $0x30] sm:$0xff]  ;;  %v63_v1 = vld [vmem:[#allocation5 + $0x20] sm:$0xff]  ;;  %v447_v57 = vlaneseq  ;;  %s603_s0 = smov [#allocation8]  }
   0xf   :  { %v61_v2 = vld [vmem:[#allocation5 + $0x10] sm:$0xff]  ;;  %v89_v3 = vand.u32 4294901760, %v65_v0  ;;  %v91_v4 = vand.u32 4294901760, %v63_v1  ;;  %v59_v6 = vld [vmem:[#allocation5] sm:$0xff]  ;;  %v58_v7 = vld [vmem:[#allocation2] sm:$0xff]  ;;  %s473_s2 = sshll.u32 %s603_s0, 4  ;;  %s474_s2 = int_to_ptr.vmem [resolvable:$true] %s473_s2 }
  0x10   :  { %v93_v5 = vand.u32 4294901760, %v61_v2  ;;  %v95_v8 = vand.u32 4294901760, %v59_v6  ;;  %v75_v9 = vsel %vm73_vm0, %v58_v7, 0  ;;  %v66_v31 = vld [vmem:[#allocation5 + $0x38] sm:$0xff]  ;;  %v64_v32 = vld [vmem:[#allocation5 + $0x28] sm:$0xff]  ;;  %v448_v62 = vand.u32 127, %v447_v57 }
  0x11   :  { %v119_v10 = vsub.f32 %v65_v0, %v89_v3  ;;  %90 = vmatpush.msra.mxu0 %v89_v3  ;;  %v125_v11 = vsub.f32 %v63_v1, %v91_v4  ;;  %190 = vmatpush.msra.mxu3 %v89_v3  ;;  %v633_v13 = vand.u32 4294901760, %v75_v9  ;;  %v62_v33 = vld [vmem:[#allocation5 + $0x18] sm:$0xff]  ;;  %v648_v34 = vand.u32 4294901760, %v66_v31  ;;  %v60_v40 = vld [vmem:[#allocation5 + $0x8] sm:$0xff]  ;;  %v67_v50 = vld [vmem:[#allocation7] sm:$0x3] }
  0x12   :  { %v131_v12 = vsub.f32 %v61_v2, %v93_v5  ;;  %v137_v14 = vsub.f32 %v59_v6, %v95_v8  ;;  %v650_v35 = vand.u32 4294901760, %v64_v32  ;;  %v652_v36 = vand.u32 4294901760, %v62_v33  ;;  %s475_s30 = sshll.u32 %s681_s3, 4  ;;  %s476_s30 = int_to_ptr.hbm [resolvable:$true] %s475_s30 }
  0x13   :  { %161 = vmatpush.msra.mxu2 %v119_v10  ;;  %92 = vmatpush.msra.mxu0 %v91_v4  ;;  %v120_v15 = vand.u32 4294901760, %v119_v10  ;;  %v126_v16 = vand.u32 4294901760, %v125_v11  ;;  %v636_v17 = vsub.f32 %v75_v9, %v633_v13  ;;  %v304_v37 = vsub.f32 %v66_v31, %v648_v34 }
  0x14   :  { %v132_v18 = vand.u32 4294901760, %v131_v12  ;;  %192 = vmatpush.msra.mxu3 %v91_v4  ;;  %v138_v19 = vand.u32 4294901760, %v137_v14  ;;  %v310_v38 = vsub.f32 %v64_v32, %v650_v35  ;;  %v316_v39 = vsub.f32 %v62_v33, %v652_v36 }
  0x15   :  { %164 = vmatpush.msra.mxu2 %v125_v11  ;;  %v121_v20 = vsub.f32 %v119_v10, %v120_v15  ;;  %94 = vmatpush.msra.mxu0 %v93_v5  ;;  %v127_v21 = vsub.f32 %v125_v11, %v126_v16  ;;  %v639_v23 = vand.u32 4294901760, %v636_v17  ;;  %v305_v41 = vand.u32 4294901760, %v304_v37 }
  0x16   :  { %v133_v22 = vsub.f32 %v131_v12, %v132_v18  ;;  %194 = vmatpush.msra.mxu3 %v93_v5  ;;  %v139_v27 = vsub.f32 %v137_v14, %v138_v19  ;;  %v311_v42 = vand.u32 4294901760, %v310_v38  ;;  %v317_v43 = vand.u32 4294901760, %v316_v39 }
  0x17   :  { %v122_v24 = vand.u32 4294901760, %v121_v20  ;;  %167 = vmatpush.msra.mxu2 %v131_v12  ;;  %v128_v25 = vand.u32 4294901760, %v127_v21  ;;  %96 = vmatpush.msra.mxu0 %v95_v8  ;;  %v100_v26 = vsub.f32 %v636_v17, %v639_v23  ;;  %v306_v44 = vsub.f32 %v304_v37, %v305_v41 }
  0x18   :  { %196 = vmatpush.msra.mxu3 %v95_v8  ;;  %v134_v28 = vand.u32 4294901760, %v133_v22  ;;  %v140_v30 = vand.u32 4294901760, %v139_v27  ;;  %v312_v45 = vsub.f32 %v310_v38, %v311_v42  ;;  %v280_v46 = vand.u32 4294901760, %v60_v40 }
  0x19   :  { %219 = vmatpush.msrb.mxu0 %v120_v15  ;;  %123 = vmatpush.msra.mxu1 %v122_v24  ;;  %v101_v29 = vand.u32 4294901760, %v100_v26  ;;  %v318_v47 = vsub.f32 %v316_v39, %v317_v43  ;;  %v307_v48 = vand.u32 4294901760, %v306_v44  ;;  %v69_v52 = vperm.slane %v67_v50, 0 }
  0x1a   :  { %170 = vmatpush.msra.mxu2 %v137_v14  ;;  %200 = vmatmul.f32.vlgmr.msra.gmra.mxu3 %v639_v23  ;;  %v313_v49 = vand.u32 4294901760, %v312_v45  ;;  %vm449_vm1 = vcmp.lt.s32.totalorder %v448_v62, 8  ;;  %v70_v15 = vperm.slane %v67_v50, 1 }
  0x1b   :  { %173 = vmatmul.f32.vlgmr.msra.gmra.mxu2 %v636_v17  ;;  %129 = vmatpush.msra.mxu1 %v128_v25  ;;  %v319_v51 = vand.u32 4294901760, %v318_v47 }
  0x1c   :  { %102 = vmatmul.f32.vlgmr.msra.gmra.mxu0 %v101_v29  ;;  %275 = vmatpush.msrb.mxu2 %v648_v34 }
  0x1d   :  { %223 = vmatpush.msrb.mxu0 %v126_v16  ;;  %135 = vmatpush.msra.mxu1 %v134_v28 }
  0x1e   :  { %277 = vmatpush.msrb.mxu2 %v650_v35  ;;  %308 = vmatpush.msrb.mxu3 %v307_v48 }
  0x1f   :  { %227 = vmatpush.msrb.mxu0 %v132_v18  ;;  %141 = vmatpush.msra.mxu1 %v140_v30 }
  0x20   :  { %143 = vmatmul.f32.vlgmr.msra.gmra.mxu1 %v633_v13  ;;  %279 = vmatpush.msrb.mxu2 %v652_v36 }
  0x21   :  { %231 = vmatpush.msrb.mxu0 %v138_v19  ;;  %250 = vmatpush.msrb.mxu1 %v89_v3 }
  0x22   :  { %281 = vmatpush.msrb.mxu2 %v280_v46  ;;  %314 = vmatpush.msrb.mxu3 %v313_v49 }
  0x23   :  { %252 = vmatpush.msrb.mxu1 %v91_v4  ;;  %346 = vmatpush.msra.mxu0 %v304_v37  ;;  %v322_v4 = vsub.f32 %v60_v40, %v280_v46 }
  0x24   :  { %233 = vmatmul.f32.vlgmr.msrb.gmra.mxu0 %v633_v13  ;;  %287 = vmatmul.f32.vlgmr.msrb.gmra.mxu2 %v101_v29 }
  0x25   :  { %254 = vmatpush.msrb.mxu1 %v93_v5  ;;  %349 = vmatpush.msra.mxu0 %v310_v38  ;;  %v323_v5 = vand.u32 4294901760, %v322_v4 }
  0x26   :  { %404 = vmatpush.msra.mxu2 %v305_v41  ;;  %320 = vmatpush.msrb.mxu3 %v319_v51 }
  0x27   :  { %256 = vmatpush.msrb.mxu1 %v95_v8  ;;  %352 = vmatpush.msra.mxu0 %v316_v39  ;;  %v324_v6 = vsub.f32 %v322_v4, %v323_v5 }
  0x28   :  { %258 = vmatmul.f32.vlgmr.msrb.gmra.mxu1 %v633_v13  ;;  %408 = vmatpush.msra.mxu2 %v311_v42 }
  0x29   :  { %375 = vmatpush.msra.mxu1 %v648_v34  ;;  %355 = vmatpush.msra.mxu0 %v322_v4  ;;  %v325_v7 = vand.u32 4294901760, %v324_v6 }
  0x2a   :  { %412 = vmatpush.msra.mxu2 %v317_v43 }
  0x2b   :  { %377 = vmatpush.msra.mxu1 %v650_v35  ;;  %326 = vmatpush.msrb.mxu3 %v325_v7 }
  0x2c   :  { %358 = vmatmul.f32.vlgmr.msra.gmra.mxu0 %v636_v17  ;;  %416 = vmatpush.msra.mxu2 %v323_v5 }
  0x2d   :  { %379 = vmatpush.msra.mxu1 %v652_v36  ;;  %418 = vmatmul.f32.vlgmr.msra.gmra.mxu2 %v633_v13 }
  0x2e   :  { %328 = vmatmul.f32.vlgmr.msrb.gmra.mxu3 %v633_v13 }
  0x2f   :  { %381 = vmatpush.msra.mxu1 %v280_v46  ;;  %435 = vmatpush.msra.mxu3 %v648_v34 }
  0x30   :  { %385 = vmatmul.f32.vlgmr.msra.gmra.mxu1 %v639_v23 }
  0x31   :  { %437 = vmatpush.msra.mxu3 %v650_v35 }
  0x33   :  { %439 = vmatpush.msra.mxu3 %v652_v36 }
  0x35   :  { %441 = vmatpush.msra.mxu3 %v280_v46 }
  0x36   :  { %443 = vmatmul.f32.vlgmr.msra.gmra.mxu3 %v633_v13 }
  0x99   :  { %v103_v53 = vpop.f32.mrf.mxu0 }
  0x9a   :  { %v104_v54 = vadd.f32 %v103_v53, %v69_v52 }
  0x9d   :  { %v144_v55 = vpop.f32.mrf.mxu1  ;;  %v201_v59 = vpop.f32.mrf.mxu3 }
  0x9e   :  { %v174_v56 = vpop.f32.mrf.mxu2  ;;  %v145_v58 = vadd.f32 %v144_v55, %v104_v54 }
  0xa0   :  { %v175_v60 = vadd.f32 %v174_v56, %v145_v58 }
  0xa1   :  { %v234_v61 = vpop.f32.mrf.mxu0 }
  0xa2   :  { %v202_v63 = vadd.f32 %v201_v59, %v175_v60 }
  0xa4   :  { %v235_v0 = vadd.f32 %v234_v61, %v202_v63 }
  0xa5   :  { %v259_v1 = vpop.f32.mrf.mxu1 }
  0xa6   :  { %v260_v2 = vadd.f32 %v259_v1, %v235_v0 }
  0xa7   :  { %v288_v16 = vpop.f32.mrf.mxu2 }
  0xa8   :  { %v450_v3 = vsel %vm449_vm1, %v260_v2, -inf  ;;  %v289_v17 = vadd.f32 %v288_v16, %v70_v15 }
  0xa9   :  { %451 = vmax.xlane.f32.xlu0 %v450_v3  ;;  %v359_v20 = vpop.f32.mrf.mxu0 }
  0xad   :  { %v386_v22 = vpop.f32.mrf.mxu1 }
  0xb0   :  { %v419_v13 = vpop.f32.mrf.mxu2 }
  0xb1   :  { %v329_v18 = vpop.f32.mrf.mxu3 }
  0xb2   :  { %v330_v19 = vadd.f32 %v329_v18, %v289_v17 }
  0xb4   :  { %v360_v21 = vadd.f32 %v359_v20, %v330_v19 }
  0xb6   :  { %v387_v23 = vadd.f32 %v386_v22, %v360_v21 }
  0xb8   :  { %v420_v24 = vadd.f32 %v419_v13, %v387_v23 }
  0xb9   :  { %v444_v25 = vpop.f32.mrf.mxu3 }
  0xba   :  { %v445_v26 = vadd.f32 %v444_v25, %v420_v24 }
  0xbc   :  { %467 = vst [vmem:[#allocation8 + $0x8] sm:$0xff] %v445_v26 }
 0x11c   :  { %v452_v8 = vpop.xlane.xlu0 %451 }
 0x11d   :  { %v453_v9 = vsub.f32 %v260_v2, %v452_v8 }
 0x11f   :  { %v454_v10 = vsel %vm449_vm1, %v453_v9, %v260_v2 }
 0x120   :  { %v455_v11 = vmul.f32 1.442695, %v454_v10 }
 0x122   :  { %492 = vpow2.f32 %v455_v11 }
 0x128   :  { %v493_v12 = vpop.eup %492 }
 0x129   :  { %v457_v14 = vsel %vm449_vm1, %v493_v12, 0.0 }
 0x12a   :  { %458 = vadd.xlane.f32.xlu0 %v457_v14 }
 0x19d   :  { %v459_v27 = vpop.xlane.xlu0 %458 }
 0x19e   :  { %494 = vrcp.f32 %v459_v27 }
 0x1a4   :  { %v495_v28 = vpop.eup %494 }
 0x1a5   :  { %v461_v29 = vmul.f32 %v495_v28, %v459_v27 }
 0x1a7   :  { %v462_v30 = vsub.f32 2.0, %v461_v29 }
 0x1a9   :  { %v463_v31 = vmul.f32 %v495_v28, %v462_v30 }
 0x1ab   :  { %v464_v32 = vmul.f32 %v493_v12, %v463_v31 }
 0x1ad   :  { %v465_v33 = vsel %vm449_vm1, %v464_v32, %v493_v12 }
 0x1ae   :  { %466 = vst [vmem:[#allocation8] sm:$0xff] %v465_v33 }
 0x1af   :  { %478 = dma.vmem_to_hbm [thread:$0]  %s474_s2, 256, %s476_s30, [#allocation4]  }
 0x1b0   :  { %596 = dma.done.wait [#allocation4], 256  }
 0x1b1   :  { %597 = vsyncadd [#allocation4], 4294967040 }
 0x1b2   :  { %483 = vsyncpa [#allocation3], 1 }
 0x1b3   :  { %484 = vsyncpa [#allocation6], 1 }
 0x1b4   :  { %485 = vsyncpa [#allocation4], 1 }

</bundles_post_ra>
